<compile_context>
chip_gen: v7x
topology: tpu7x:2x2x1
jax: 0.10.0
libtpu: 0.0.40
codegen_flags: <defaults>
</compile_context>

<pallas_src>
import functools

import jax
import jax.numpy as jnp
from jax.experimental import pallas as pl
from jax.experimental.pallas import tpu as pltpu


def _round_up(x, m):
    return ((x + m - 1) // m) * m


def _bbox_linproj_kernel(ltwh_ref, side_ref, wbd_ref, *rest, use_conf):
    # ltwh_ref: (TM, 4*PACK)   PACK logical rows' ltwh packed per sublane row
    # side_ref: (TM, 2*PACK)   [packed conf | packed gate]   (or (TM, PACK)
    #                          gate only when use_conf=False)
    # wbd_ref:  (4*PACK, L)    block-diagonal ltwh weight, L = PACK*H
    # wside_ref:(2*PACK, L)    block-diag conf weight rows (top), zeros (bottom)
    # eside_ref:(side_w, L)    gate-expansion: gate slot j -> lanes [j*H,(j+1)*H)
    # bias_ref: (1, L)         bias tiled PACK times
    # out_ref:  (TM, L)        lane-dense packed output (L = 128 when H = 32)
    if use_conf:
        wside_ref, eside_ref, bias_ref, out_ref = rest
    else:
        eside_ref, bias_ref, out_ref = rest
    side = side_ref[...]
    y = jnp.dot(ltwh_ref[...], wbd_ref[...], preferred_element_type=jnp.float32)
    if use_conf:
        y = y + jnp.dot(side, wside_ref[...],
                        preferred_element_type=jnp.float32)
    y = y + bias_ref[...]
    gate = jnp.dot(side, eside_ref[...], preferred_element_type=jnp.float32)
    out_ref[...] = y * gate


def bbox_lin_proj(bbox_ltwh, bbox_conf, feats_masks, drop_bbox,
                  weight, bias, *, use_conf=True, tm=2048):
    """
    bbox_ltwh:   (B, N, 4) float32
    bbox_conf:   (B, N, 1) float32 (ignored / may be None if use_conf=False)
    feats_masks: (B, N)    bool
    drop_bbox:   (B, N) or (B, N, 1) values in {0, 1}, or None
    weight:      (H, F)    float32 (torch nn.Linear layout), F = 4 + use_conf
    bias:        (H,)      float32
    tm:          row tile in PACKED rows (each packed row = PACK logical rows)
    returns tokens (B, N, H) float32
    """
    B, N, _ = bbox_ltwh.shape
    H = weight.shape[0]
    M = B * N

    # Lane-dense packing factor: PACK logical rows per 128-lane output row.
    # (pack == 1 fallback -> masked lane-sparse stores, correct but slower.)
    pack = 128 // H if (H <= 128 and 128 % H == 0) else 1
    L = pack * H

    # --- flatten inputs, fuse gate, (tiny) pad only if M % pack != 0 --------
    ltwh2 = bbox_ltwh.reshape(M, 4).astype(jnp.float32)
    gate = feats_masks.reshape(M).astype(jnp.float32)
    if drop_bbox is not None:
        gate = gate * (drop_bbox.reshape(M) != 1).astype(jnp.float32)
    if use_conf:
        conf1 = (bbox_conf.reshape(M).astype(jnp.float32)
                 if bbox_conf is not None else jnp.zeros((M,), jnp.float32))

    rem = (-M) % pack                     # <= pack-1 logical pad rows
    if rem:
        ltwh2 = jnp.pad(ltwh2, ((0, rem), (0, 0)))
        gate = jnp.pad(gate, ((0, rem),))          # pad rows -> gate 0
        if use_conf:
            conf1 = jnp.pad(conf1, ((0, rem),))
    Mp = M + rem
    r = Mp // pack                        # packed rows (exact, no tile pad)

    ltwh_p = ltwh2.reshape(r, 4 * pack)
    gate_p = gate.reshape(r, pack)
    if use_conf:
        side = jnp.concatenate([conf1.reshape(r, pack), gate_p], axis=1)
    else:
        side = gate_p
    side_w = side.shape[1]

    # --- tiny packed (block-diagonal) parameters ----------------------------
    w_t = weight.astype(jnp.float32).T                        # (F, H)
    eye_p = jnp.eye(pack, dtype=jnp.float32)
    wbd = jnp.kron(eye_p, w_t[:4])                            # (4*pack, L)
    e_blk = jnp.kron(eye_p, jnp.ones((1, H), jnp.float32))    # (pack, L)
    consts = [wbd]
    if use_conf:
        wconf_blk = jnp.kron(eye_p, w_t[4:5])                 # (pack, L)
        wside = jnp.concatenate([wconf_blk, jnp.zeros_like(wconf_blk)], axis=0)
        eside = jnp.concatenate([jnp.zeros_like(e_blk), e_blk], axis=0)
        consts += [wside, eside]                              # (2*pack, L) each
    else:
        consts += [e_blk]                                     # (pack, L)
    bias_t = jnp.tile(bias.astype(jnp.float32), pack).reshape(1, L)
    consts += [bias_t]

    # --- tile / grid selection ----------------------------------------------
    # Big tiles (default 2048 packed rows) to amortize grid-step overhead, and
    # at least 2 (ideally even) roughly balanced steps for v7x's two TCs.
    tm_req = max(8, _round_up(int(tm), 8))
    tm_p = min(tm_req, _round_up(r, 8))
    n_steps = -(-r // tm_p)
    if n_steps == 1 and r > 8:
        n_steps = 2
    elif n_steps > 1 and (n_steps % 2):
        n_steps += 1
    if n_steps > 1:
        tm_p = _round_up(-(-r // n_steps), 8)
    n_steps = -(-r // tm_p)
    # The last block may be partial (n_steps * tm_p >= r): the boundary DMA is
    # clamped by Pallas, OOB reads only affect OOB output rows, whose writes
    # are discarded. No host-side padding of every input to a tile multiple.

    in_specs = [
        pl.BlockSpec((tm_p, 4 * pack), lambda i: (i, 0)),     # ltwh tile
        pl.BlockSpec((tm_p, side_w), lambda i: (i, 0)),       # conf|gate tile
        pl.BlockSpec((4 * pack, L), lambda i: (0, 0)),        # wbd (const)
    ]
    if use_conf:
        in_specs += [pl.BlockSpec((side_w, L), lambda i: (0, 0)),   # wside
                     pl.BlockSpec((side_w, L), lambda i: (0, 0))]   # eside
    else:
        in_specs += [pl.BlockSpec((side_w, L), lambda i: (0, 0))]   # eside
    in_specs += [pl.BlockSpec((1, L), lambda i: (0, 0))]            # bias

    out = pl.pallas_call(
        functools.partial(_bbox_linproj_kernel, use_conf=use_conf),
        out_shape=jax.ShapeDtypeStruct((r, L), jnp.float32),
        grid_spec=pltpu.PrefetchScalarGridSpec(
            num_scalar_prefetch=0,
            grid=(n_steps,),
            in_specs=in_specs,
            out_specs=pl.BlockSpec((tm_p, L), lambda i: (i, 0)),
        ),
        compiler_params=pltpu.CompilerParams(
            dimension_semantics=("parallel",)),
    )(ltwh_p, side, *consts)

    tokens = out.reshape(Mp, H)       # free reshape (contiguous)
    if rem:
        tokens = tokens[:M]           # only when M % pack != 0
    return tokens.reshape(B, N, H)


def _reference(bbox_ltwh, bbox_conf, feats_masks, drop_bbox, weight, bias,
               use_conf=True):
    feats = (jnp.concatenate([bbox_ltwh, bbox_conf], axis=-1)
             if use_conf else bbox_ltwh)
    # Exact f32 (VPU) reference, independent of matmul precision defaults.
    y = (feats[..., None, :] * weight[None, None, :, :]).sum(-1) + bias
    if drop_bbox is not None:
        d = drop_bbox.reshape(*feats_masks.shape)
        y = jnp.where((d == 1)[..., None], 0.0, y)
    return jnp.where(feats_masks[..., None], y, 0.0).astype(jnp.float32)


if __name__ == "__main__":
    key = jax.random.PRNGKey(0)
    k_ltwh, k_conf, k_mask, k_drop, k_w, k_b = jax.random.split(key, 6)

    B, N = 2, 16            # 2 batches of 16 detection slots -> 32 rows
    hidden_dim = 32
    use_conf = True
    F = 4 + (1 if use_conf else 0)

    bbox_ltwh = jax.random.uniform(k_ltwh, (B, N, 4), dtype=jnp.float32)
    bbox_conf = jax.random.uniform(k_conf, (B, N, 1), dtype=jnp.float32)
    feats_masks = jax.random.uniform(k_mask, (B, N)) > 0.3
    drop_bbox = (jax.random.uniform(k_drop, (B, N)) > 0.8).astype(jnp.int32)

    weight = (jax.random.normal(k_w, (hidden_dim, F), dtype=jnp.float32)
              * (1.0 / jnp.sqrt(F)))
    bias = jax.random.normal(k_b, (hidden_dim,), dtype=jnp.float32) * 0.01

    tokens = bbox_lin_proj(bbox_ltwh, bbox_conf, feats_masks, drop_bbox,
                           weight, bias, use_conf=use_conf)
    tokens = jax.block_until_ready(tokens)

    ref = _reference(bbox_ltwh, bbox_conf, feats_masks, drop_bbox,
                     weight, bias, use_conf=use_conf)

    assert tokens.shape == (B, N, hidden_dim)
    assert tokens.dtype == jnp.float32
    assert jnp.allclose(tokens, ref, atol=1e-5, rtol=1e-5), "mismatch (case 1)"

    # Case 2: ragged row count (M % pack != 0 -> tiny-pad path) + multi-step
    # grid with a partial last block (tm=8 forces several steps).
    B2, N2 = 3, 50
    k2 = jax.random.split(jax.random.PRNGKey(1), 4)
    ltwh2 = jax.random.uniform(k2[0], (B2, N2, 4), dtype=jnp.float32)
    conf2 = jax.random.uniform(k2[1], (B2, N2, 1), dtype=jnp.float32)
    mask2 = jax.random.uniform(k2[2], (B2, N2)) > 0.3
    drop2 = (jax.random.uniform(k2[3], (B2, N2)) > 0.8).astype(jnp.int32)

    tok2 = jax.block_until_ready(
        bbox_lin_proj(ltwh2, conf2, mask2, drop2, weight, bias,
                      use_conf=use_conf, tm=8))
    ref2 = _reference(ltwh2, conf2, mask2, drop2, weight, bias,
                      use_conf=use_conf)
    assert tok2.shape == (B2, N2, hidden_dim)
    assert jnp.allclose(tok2, ref2, atol=1e-5, rtol=1e-5), "mismatch (case 2)"

    # Case 3: use_conf=False, no drop_bbox, 2-step grid with a partial block
    # and no host-side padding at all (M % pack == 0).
    B3, N3 = 2, 20
    k3 = jax.random.split(jax.random.PRNGKey(2), 4)
    ltwh3 = jax.random.uniform(k3[0], (B3, N3, 4), dtype=jnp.float32)
    mask3 = jax.random.uniform(k3[1], (B3, N3)) > 0.3
    w3 = (jax.random.normal(k3[2], (hidden_dim, 4), dtype=jnp.float32)
          * (1.0 / jnp.sqrt(4.0)))
    b3 = jax.random.normal(k3[3], (hidden_dim,), dtype=jnp.float32) * 0.01

    tok3 = jax.block_until_ready(
        bbox_lin_proj(ltwh3, None, mask3, None, w3, b3, use_conf=False))
    ref3 = _reference(ltwh3, None, mask3, None, w3, b3, use_conf=False)
    assert tok3.shape == (B3, N3, hidden_dim)
    assert jnp.allclose(tok3, ref3, atol=1e-5, rtol=1e-5), "mismatch (case 3)"

    print("KERNEL_OK")
</pallas_src>

<mosaic_0001>
module attributes {stable_mosaic.version = 11 : i64} {
  func.func @_bbox_linproj_kernel(%arg0: i32, %arg1: memref<8x16xf32, #tpu.memory_space<vmem>>, %arg2: memref<8x8xf32, #tpu.memory_space<vmem>>, %arg3: memref<16x128xf32, #tpu.memory_space<vmem>>, %arg4: memref<8x128xf32, #tpu.memory_space<vmem>>, %arg5: memref<8x128xf32, #tpu.memory_space<vmem>>, %arg6: memref<1x128xf32, #tpu.memory_space<vmem>>, %arg7: memref<8x128xf32, #tpu.memory_space<vmem>>) attributes {dimension_semantics = [#tpu.dimension_semantics<parallel>], iteration_bounds = array<i64: 1>, scalar_prefetch = 0 : i64, scratch_operands = 0 : i64, tpu.core_type = #tpu.core_type<tc>, window_params = [{transform_indices = @transform_0, window_bounds = array<i64: 8, 16>}, {transform_indices = @transform_1, window_bounds = array<i64: 8, 8>}, {pipeline_mode = #tpu.pipeline_mode<synchronous>, transform_indices = @transform_2, window_bounds = array<i64: 16, 128>}, {pipeline_mode = #tpu.pipeline_mode<synchronous>, transform_indices = @transform_3, window_bounds = array<i64: 8, 128>}, {pipeline_mode = #tpu.pipeline_mode<synchronous>, transform_indices = @transform_4, window_bounds = array<i64: 8, 128>}, {pipeline_mode = #tpu.pipeline_mode<synchronous>, transform_indices = @transform_5, window_bounds = array<i64: 1, 128>}, {transform_indices = @transform_6, window_bounds = array<i64: 8, 128>}]} {
    %c0 = arith.constant 0 : index
    %c0_0 = arith.constant 0 : index
    %0 = vector.load %arg2[%c0, %c0_0] : memref<8x8xf32, #tpu.memory_space<vmem>>, vector<8x8xf32>
    %c0_1 = arith.constant 0 : index
    %c0_2 = arith.constant 0 : index
    %1 = vector.load %arg1[%c0_1, %c0_2] : memref<8x16xf32, #tpu.memory_space<vmem>>, vector<8x16xf32>
    %c0_3 = arith.constant 0 : index
    %c0_4 = arith.constant 0 : index
    %2 = vector.load %arg3[%c0_3, %c0_4] : memref<16x128xf32, #tpu.memory_space<vmem>>, vector<16x128xf32>
    %cst = arith.constant dense<0.000000e+00> : vector<8x128xf32>
    %3 = tpu.matmul %1, %2, %cst {dimension_numbers = #tpu.dot_dimension_numbers<[1], [0], [0], [1], [0, 0, 1, 1], [], []>} : vector<8x16xf32>, vector<16x128xf32>, vector<8x128xf32> -> vector<8x128xf32>
    %c0_5 = arith.constant 0 : index
    %c0_6 = arith.constant 0 : index
    %4 = vector.load %arg4[%c0_5, %c0_6] : memref<8x128xf32, #tpu.memory_space<vmem>>, vector<8x128xf32>
    %cst_7 = arith.constant dense<0.000000e+00> : vector<8x128xf32>
    %5 = tpu.matmul %0, %4, %cst_7 {dimension_numbers = #tpu.dot_dimension_numbers<[1], [0], [0], [1], [0, 0, 1, 1], [], []>} : vector<8x8xf32>, vector<8x128xf32>, vector<8x128xf32> -> vector<8x128xf32>
    %6 = arith.addf %3, %5 : vector<8x128xf32>
    %c0_8 = arith.constant 0 : index
    %c0_9 = arith.constant 0 : index
    %7 = vector.load %arg6[%c0_8, %c0_9] : memref<1x128xf32, #tpu.memory_space<vmem>>, vector<1x128xf32>
    %8 = vector.broadcast %7 : vector<1x128xf32> to vector<8x128xf32>
    %9 = arith.addf %6, %8 : vector<8x128xf32>
    %c0_10 = arith.constant 0 : index
    %c0_11 = arith.constant 0 : index
    %10 = vector.load %arg5[%c0_10, %c0_11] : memref<8x128xf32, #tpu.memory_space<vmem>>, vector<8x128xf32>
    %cst_12 = arith.constant dense<0.000000e+00> : vector<8x128xf32>
    %11 = tpu.matmul %0, %10, %cst_12 {dimension_numbers = #tpu.dot_dimension_numbers<[1], [0], [0], [1], [0, 0, 1, 1], [], []>} : vector<8x8xf32>, vector<8x128xf32>, vector<8x128xf32> -> vector<8x128xf32>
    %12 = arith.mulf %9, %11 : vector<8x128xf32>
    %c0_13 = arith.constant 0 : index
    %c0_14 = arith.constant 0 : index
    %13 = vector.load %arg7[%c0_13, %c0_14] : memref<8x128xf32, #tpu.memory_space<vmem>>, vector<8x128xf32>
    tpu.vector_store %arg7[%c0_13, %c0_14], %12 {strides = array<i32>} : memref<8x128xf32, #tpu.memory_space<vmem>>, vector<8x128xf32>,
    return
  }
  func.func @transform_0(%arg0: i32) -> (i32, i32) {
    %c0_i32 = arith.constant 0 : i32
    %c0_i32_0 = arith.constant 0 : i32
    return %arg0, %c0_i32 : i32, i32
  }
  func.func @transform_1(%arg0: i32) -> (i32, i32) {
    %c0_i32 = arith.constant 0 : i32
    %c0_i32_0 = arith.constant 0 : i32
    return %arg0, %c0_i32 : i32, i32
  }
  func.func @transform_2(%arg0: i32) -> (i32, i32) {
    %c0_i32 = arith.constant 0 : i32
    %c0_i32_0 = arith.constant 0 : i32
    %c0_i32_1 = arith.constant 0 : i32
    return %c0_i32, %c0_i32_0 : i32, i32
  }
  func.func @transform_3(%arg0: i32) -> (i32, i32) {
    %c0_i32 = arith.constant 0 : i32
    %c0_i32_0 = arith.constant 0 : i32
    %c0_i32_1 = arith.constant 0 : i32
    return %c0_i32, %c0_i32_0 : i32, i32
  }
  func.func @transform_4(%arg0: i32) -> (i32, i32) {
    %c0_i32 = arith.constant 0 : i32
    %c0_i32_0 = arith.constant 0 : i32
    %c0_i32_1 = arith.constant 0 : i32
    return %c0_i32, %c0_i32_0 : i32, i32
  }
  func.func @transform_5(%arg0: i32) -> (i32, i32) {
    %c0_i32 = arith.constant 0 : i32
    %c0_i32_0 = arith.constant 0 : i32
    %c0_i32_1 = arith.constant 0 : i32
    return %c0_i32, %c0_i32_0 : i32, i32
  }
  func.func @transform_6(%arg0: i32) -> (i32, i32) {
    %c0_i32 = arith.constant 0 : i32
    %c0_i32_0 = arith.constant 0 : i32
    return %arg0, %c0_i32 : i32, i32
  }
}

</mosaic_0001>

<bundles_post_ra>
// kernel: tpu_custom_call.1
= control target key start
LH: loop header
LB: loop body
LE: loop exit
PB: predicated region body
PF: predicated region fallthrough
CT: control target
= control target key end

     0   :  { %11 = vsyncpa [#allocation3], 0  ;;  %s599_s0 = inlined_call_operand.hbm [shape: f32[8,16], index: 0, kind: input, shape index: {}]   ;;  %s600_s1 = inlined_call_operand.hbm [shape: f32[8,8], index: 1, kind: input, shape index: {}]   ;;  %s601_s2 = inlined_call_operand.hbm [shape: f32[16,128], index: 2, kind: input, shape index: {}]   ;;  %s602_s3 = inlined_call_operand.vmem [shape: f32[8,128], index: 3, kind: input, shape index: {}]   ;;  %s603_s4 = inlined_call_operand.hbm [shape: f32[8,128], index: 4, kind: input, shape index: {}]   ;;  %s604_s5 = inlined_call_operand.vmem [shape: f32[1,128], index: 5, kind: input, shape index: {}]   ;;  %s605_s6 = inlined_call_operand.hbm [shape: f32[8,128], index: 6, kind: output, shape index: {}]  }
   0x1   :  { %12 = vsyncpa [#allocation6], 0 }
   0x2   :  { %13 = vsyncpa [#allocation9], 0 }
   0x3   :  { %14 = vsyncpa [#allocation4], 0  ;;  %s483_s21 = smov [#allocation5]   ;;  %s484_s23 = smov [#allocation2]  }
   0x4   :  { %s31_s22 = sshll.u32 %s483_s21, 4  ;;  %s21_s24 = sshll.u32 %s484_s23, 4  ;;  %s32_s22 = int_to_ptr.vmem [resolvable:$true] %s31_s22  ;;  %s22_s24 = int_to_ptr.vmem [resolvable:$true] %s21_s24 }
   0x5   :  { %s365_s27 = scalar_lea.hbm %s600_s1, 128 }
   0x6   :  { %p366_p0 = scmp.ne.s32.totalorder %s600_s1, %s365_s27  ;;  %p369_p1 = scmp.lt.u32.totalorder %s365_s27, %s600_s1 }
   0x8   :  { %p371_p2 = pnand %p369_p1, %p366_p0 }
   0xa   :  { %374 = shalt.err (!%p371_p2)
}
   0xb   :  { %s375_s8 = scalar_lea.vmem %s32_s22, 128  ;;  %p380_p4 = scmp.lt.s32.totalorder %s32_s22, %s32_s22 }
   0xc   :  { %p376_p3 = scmp.ne.s32.totalorder %s32_s22, %s375_s8  ;;  %p381_p5 = scmp.lt.s32.totalorder %s375_s8, %s375_s8 }
   0xe   :  { %p382_p6 = por %p381_p5, %p380_p4 }
  0x10   :  { %p383_p7 = pnand %p382_p6, %p376_p3 }
  0x12   :  { %386 = shalt.err (!%p383_p7)
}
  0x13   :  { %34 = dma.hbm_to_vmem [thread:$0]  %s600_s1, 128, %s32_s22, [#allocation6]  }
  0x14   :  { %s387_s13 = scalar_lea.hbm %s599_s0, 128 }
  0x15   :  { %p388_p8 = scmp.ne.s32.totalorder %s599_s0, %s387_s13  ;;  %p391_p9 = scmp.lt.u32.totalorder %s387_s13, %s599_s0 }
  0x17   :  { %p393_p10 = pnand %p391_p9, %p388_p8 }
  0x19   :  { %396 = shalt.err (!%p393_p10)
}
  0x1a   :  { %s397_s18 = scalar_lea.vmem %s22_s24, 128  ;;  %p402_p12 = scmp.lt.s32.totalorder %s22_s24, %s22_s24 }
  0x1b   :  { %p398_p11 = scmp.ne.s32.totalorder %s22_s24, %s397_s18  ;;  %p403_p13 = scmp.lt.s32.totalorder %s397_s18, %s397_s18 }
  0x1d   :  { %p404_p0 = por %p403_p13, %p402_p12 }
  0x1f   :  { %p405_p1 = pnand %p404_p0, %p398_p11 }
  0x21   :  { %408 = shalt.err (!%p405_p1)
}
  0x22   :  { %24 = dma.hbm_to_vmem [thread:$0]  %s599_s0, 128, %s22_s24, [#allocation3]  }
  0x23   :  { %s485_s20 = smov [#allocation7]   ;;  %s409_s25 = scalar_lea.hbm %s601_s2, 256 }
  0x24   :  { %s40_s21 = sshll.u32 %s485_s20, 4  ;;  %p410_p2 = scmp.ne.s32.totalorder %s601_s2, %s409_s25  ;;  %s41_s21 = int_to_ptr.vmem [resolvable:$true] %s40_s21 }
  0x25   :  { %p413_p3 = scmp.lt.u32.totalorder %s409_s25, %s601_s2 }
  0x27   :  { %p415_p4 = pnand %p413_p3, %p410_p2 }
  0x29   :  { %418 = shalt.err (!%p415_p4)
}
  0x2a   :  { %s419_s30 = scalar_lea.vmem %s41_s21, 256  ;;  %p424_p6 = scmp.lt.s32.totalorder %s41_s21, %s41_s21 }
  0x2b   :  { %p420_p5 = scmp.ne.s32.totalorder %s41_s21, %s419_s30  ;;  %p425_p7 = scmp.lt.s32.totalorder %s419_s30, %s419_s30 }
  0x2d   :  { %p426_p8 = por %p425_p7, %p424_p6 }
  0x2f   :  { %p427_p9 = pnand %p426_p8, %p420_p5 }
  0x31   :  { %430 = shalt.err (!%p427_p9)
}
  0x32   :  { %s486_s0 = smov 128   ;;  %s487_s24 = smov 8  }
  0x33   :  { %46 = dma.hbm_to_vmem [thread:$0]  %s601_s2, 256, %s41_s21, [#allocation6], %s486_s0, %s486_s0, %s487_s24  }
  0x34   :  { %s488_s9 = smov [#allocation8]   ;;  %s431_s13 = scalar_lea.hbm %s603_s4, 128 }
  0x35   :  { %s55_s10 = sshll.u32 %s488_s9, 4  ;;  %p432_p10 = scmp.ne.s32.totalorder %s603_s4, %s431_s13  ;;  %s56_s10 = int_to_ptr.vmem [resolvable:$true] %s55_s10 }
  0x36   :  { %p435_p11 = scmp.lt.u32.totalorder %s431_s13, %s603_s4 }
  0x38   :  { %p437_p12 = pnand %p435_p11, %p432_p10 }
  0x3a   :  { %440 = shalt.err (!%p437_p12)
}
  0x3b   :  { %s441_s18 = scalar_lea.vmem %s56_s10, 128  ;;  %p446_p0 = scmp.lt.s32.totalorder %s56_s10, %s56_s10 }
  0x3c   :  { %p442_p13 = scmp.ne.s32.totalorder %s56_s10, %s441_s18  ;;  %p447_p1 = scmp.lt.s32.totalorder %s441_s18, %s441_s18 }
  0x3e   :  { %p448_p2 = por %p447_p1, %p446_p0 }
  0x40   :  { %p449_p3 = pnand %p448_p2, %p442_p13 }
  0x42   :  { %452 = shalt.err (!%p449_p3)
}
  0x43   :  { %58 = dma.hbm_to_vmem [thread:$0]  %s603_s4, 128, %s56_s10, [#allocation9]  }
  0x44   :  { %475 = dma.done.wait [#allocation3], 128  }
  0x45   :  { %476 = vsyncadd [#allocation3], 4294967168 }
  0x46   :  { %477 = dma.done.wait [#allocation6], 384  }
  0x47   :  { %478 = vsyncadd [#allocation6], 4294966912 }
  0x48   :  { %479 = dma.done.wait [#allocation9], 128  }
  0x49   :  { %480 = vsyncadd [#allocation9], 4294967168  ;;  %v489_v0 = vmov 0.0|0.0   ;;  %v490_v1 = vmov 0.0   ;;  %vm491_vm0 = vmmov 0   ;;  %vm78_vm1 = vcmask 64512  }
  0x4a   :  { %352 = vmatprep.subr.bf16.mxu1 %v489_v0  ;;  %335 = vmatprep.subr.mxu0 %v490_v1  ;;  %v75_v2 = vld [vmem:[#allocation7] sm:$0xff]  ;;  %v76_v3 = vld [vmem:[#allocation7 + $0x8] sm:$0xff]  ;;  %v77_v4 = vld [vmem:[%s602_s3] sm:$0xff]  ;;  %vm152_vm2 = vcmask 130048   ;;  %s492_s21 = smov [#allocation10]  }
  0x4b   :  { %337 = vmatprep.mubr.msk.f32.mxu0 %vm491_vm0, %v490_v1  ;;  %344 = vmatprep.mubr.msk.f32.mxu1 %vm491_vm0, %v490_v1  ;;  %v353_v5 = vpack.c.bf16 %v76_v3, %v75_v2  ;;  %v73_v6 = vld [vmem:[#allocation5] sm:$0xff]  ;;  %v234_v7 = vld [vmem:[#allocation8] sm:$0xff]  ;;  %s313_s22 = sshll.u32 %s492_s21, 4  ;;  %s314_s22 = int_to_ptr.vmem [resolvable:$true] %s313_s22 }
  0x4c   :  { %336 = vmatpush3.msra.mxu0 %v77_v4  ;;  %v74_v8 = vld [vmem:[#allocation2] sm:$0xff]  ;;  %s453_s23 = scalar_lea.vmem %s314_s22, 128  ;;  %p458_p5 = scmp.lt.s32.totalorder %s314_s22, %s314_s22 }
  0x4d   :  { %338 = vmatmul.mubr.msk.f32.vlgmr.msra.gmra.mrb[0].mxu0 %vm78_vm1, %v73_v6  ;;  %347 = vmatprep.subr.mxu0 %v490_v1  ;;  %v326_v12 = vld [vmem:[%s604_s5] ss:$0 sm:$0xff]  ;;  %p454_p4 = scmp.ne.s32.totalorder %s314_s22, %s453_s23  ;;  %p459_p6 = scmp.lt.s32.totalorder %s453_s23, %s453_s23 }
  0x4e   :  { %354 = vmatpush3.bf16.msra.mxu1 %v353_v5  ;;  %348 = vmatpush3.msra.mxu0 %v234_v7 }
  0x4f   :  { %349 = vmatprep.mubr.msk.f32.mxu0 %vm491_vm0, %v490_v1  ;;  %p460_p7 = por %p459_p6, %p458_p5 }
  0x51   :  { %345 = vmatmul.mubr.msk.f32.vlgmr.msra.gmra.mrb[0].mxu1 %vm152_vm2, %v74_v8  ;;  %350 = vmatmul.mubr.msk.f32.vlgmr.msra.gmra.mrb[2].mxu0 %vm78_vm1, %v73_v6  ;;  %p461_p8 = pnand %p460_p7, %p454_p4 }
 0x120   :  { %v148_v9 = vpop.f32.mrb[0].mxu0 }
 0x121   :  { %v339_v10 = vpop.f32.mrb[1].mxu0 }
 0x124   :  { %v222_v11 = vpop.f32.mrb[0].mxu1  ;;  %v301_v13 = vpop.f32.mrb[2].mxu0 }
 0x125   :  { %v223_v14 = vadd.f32 %v222_v11, %v148_v9  ;;  %v346_v15 = vpop.f32.mrb[1].mxu1  ;;  %v351_v16 = vpop.f32.mrb[3].mxu0 }
 0x127   :  { %v233_v17 = vadd.f32 %v326_v12, %v223_v14 }
 0x129   :  { %v305_v18 = vmul.f32 %v301_v13, %v233_v17 }
 0x12b   :  { %306 = vst [vmem:[#allocation10] sm:$0xff] %v305_v18 }
 0x12c   :  { %464 = shalt.err (!%p461_p8)
}
 0x12d   :  { %s465_s5 = scalar_lea.hbm %s605_s6, 128 }
 0x12e   :  { %p466_p9 = scmp.ne.s32.totalorder %s605_s6, %s465_s5  ;;  %p469_p10 = scmp.lt.u32.totalorder %s465_s5, %s605_s6 }
 0x130   :  { %p471_p11 = pnand %p469_p10, %p466_p9 }
 0x132   :  { %474 = shalt.err (!%p471_p11)
}
 0x133   :  { %316 = dma.vmem_to_hbm [thread:$0]  %s314_s22, 128, %s605_s6, [#allocation4]  }
 0x134   :  { %481 = dma.done.wait [#allocation4], 128  }
 0x135   :  { %482 = vsyncadd [#allocation4], 4294967168 }
 0x136   :  { %320 = vsyncpa [#allocation3], 1 }
 0x137   :  { %321 = vsyncpa [#allocation6], 1 }
 0x138   :  { %322 = vsyncpa [#allocation9], 1 }
 0x139   :  { %323 = vsyncpa [#allocation4], 1 }

</bundles_post_ra>
